<compile_context>
chip_gen: v6e
topology: v6e:2x2x1
jax: 0.10.0
libtpu: 0.0.40
codegen_flags: <defaults>
</compile_context>

<pallas_src>
import functools
import math

import jax
import jax.numpy as jnp
from jax.experimental import pallas as pl
from jax.experimental.pallas import tpu as pltpu


# ----------------------------- VMEM budgeting --------------------------------
def _compiler_params(semantics, vmem_bytes_needed):
    """Set an explicit scoped-VMEM limit only when the tiles are large enough
    that the per-generation defaults (16 MiB v5e / 32 MiB v6e,v7x) could bite;
    cap below v7x's 64 MiB physical per-TensorCore."""
    limit = None
    if vmem_bytes_needed > 12 * (1 << 20):
        limit = min(int(vmem_bytes_needed * 3 // 2) + (2 << 20), 60 * (1 << 20))
    return pltpu.CompilerParams(dimension_semantics=semantics,
                                vmem_limit_bytes=limit)


# ------------------------- Kernel 1: fused QKV projection --------------------
def _qkv_proj_kernel(x_ref, w_ref, b_ref, o_ref):
    # x_ref: (rows_blk, C) bf16, w_ref: (C, n_blk) bf16, b_ref: (1, n_blk) f32
    acc = jnp.dot(x_ref[...], w_ref[...], preferred_element_type=jnp.float32)
    o_ref[...] = (acc + b_ref[...]).astype(o_ref.dtype)


# -------------- Kernel 2: flash attention + fused output projection ----------
def _attn_proj_kernel(q_ref, k_ref, v_ref, wp_ref, bp_ref, o_ref,
                      m_sc, l_sc, acc_sc, *, block_q, block_kv, scale):
    qi = pl.program_id(1)
    ki = pl.program_id(2)
    nk = pl.num_programs(2)
    q_start = qi * block_q
    k_start = ki * block_kv

    # ---- init online-softmax state at the first kv block ----
    @pl.when(ki == 0)
    def _():
        m_sc[...] = jnp.full_like(m_sc, -jnp.inf)
        l_sc[...] = jnp.zeros_like(l_sc)
        acc_sc[...] = jnp.zeros_like(acc_sc)

    def flash_update(apply_mask):
        # scale folded into q: H*bq*D bf16 muls instead of H*bq*bk f32 muls
        q = q_ref[0] * jnp.asarray(scale, dtype=q_ref.dtype)   # (H, bq, D)
        k = k_ref[0]                                           # (H, D, bk)
        v = v_ref[0]                                           # (H, bk, D)
        s = jnp.einsum('hqd,hdk->hqk', q, k,
                       preferred_element_type=jnp.float32)     # (H, bq, bk)
        if apply_mask:
            row = q_start + jax.lax.broadcasted_iota(
                jnp.int32, (block_q, block_kv), 0)
            col = k_start + jax.lax.broadcasted_iota(
                jnp.int32, (block_q, block_kv), 1)
            # Large finite fill is NaN-safe: every q row has already seen a
            # visible column in its first executed kv block (ki == 0), so m is
            # finite and exp() underflows to 0 for masked entries.
            s = jnp.where((row >= col)[None, :, :], s, -1e30)
        m_prev = m_sc[...]                                     # (H, bq, 1)
        m_new = jnp.maximum(m_prev, jnp.max(s, axis=-1, keepdims=True))
        alpha = jnp.exp(m_prev - m_new)
        p = jnp.exp(s - m_new)                                 # f32 numerator
        l_sc[...] = alpha * l_sc[...] + jnp.sum(p, axis=-1, keepdims=True)
        acc_sc[...] = alpha * acc_sc[...] + jnp.einsum(
            'hqk,hkd->hqd', p.astype(v.dtype), v,
            preferred_element_type=jnp.float32)
        m_sc[...] = m_new

    # ---- fully-visible kv block: skip all mask work ----
    @pl.when(k_start + block_kv <= q_start)
    def _():
        flash_update(apply_mask=False)

    # ---- diagonal kv block(s): apply causal mask ----
    @pl.when(jnp.logical_and(k_start < q_start + block_q,
                             k_start + block_kv > q_start))
    def _():
        flash_update(apply_mask=True)

    # ---- finalize: normalize; head-merge folded into the output projection,
    #      accumulating per-head matmuls into a single (bq, C) f32 tile ----
    @pl.when(ki == nk - 1)
    def _():
        n_head, _d, c = wp_ref.shape
        inv_l = pl.reciprocal(l_sc[...], approx=True)          # (H, bq, 1)
        out = jnp.zeros((block_q, c), jnp.float32)
        for h in range(n_head):                                # static, small
            o_h = (acc_sc[h] * inv_l[h]).astype(wp_ref.dtype)  # (bq, D) bf16
            out = out + jnp.dot(o_h, wp_ref[h],
                                preferred_element_type=jnp.float32)
        o_ref[0] = (out + bp_ref[...]).astype(o_ref.dtype)


# ------------------------------- wrapper --------------------------------------
def multi_head_self_attention(x, w_attn, b_attn, w_proj, b_proj, *, n_head,
                              block_q=128, block_kv=128):
    """x: (B, T, C) f32.  w_attn: (C, 3C), b_attn: (1, 3C), w_proj: (C, C),
    b_proj: (1, C).  Returns (B, T, C) f32.

    block_q/block_kv = 128 is the portable default; sweep 256 on v6e/v7x."""
    B, T, C = x.shape
    assert C % n_head == 0
    D = C // n_head
    three_c = 3 * C

    # bf16 MXU inputs (halves DMA bytes); accumulation stays f32 in-kernel.
    x_bf = x.astype(jnp.bfloat16).reshape(B * T, C)
    w_attn_bf = w_attn.astype(jnp.bfloat16)
    w_proj_hdc = w_proj.reshape(n_head, D, C).astype(jnp.bfloat16)

    # ---- Kernel 1: QKV projection over flattened (B*T) rows ----
    rows = B * T
    row_block = min(512, rows)
    rows_p = pl.cdiv(rows, row_block) * row_block
    if rows_p != rows:
        x_bf = jnp.pad(x_bf, ((0, rows_p - rows), (0, 0)))

    # Tile the 3C output axis when the resident weight would strain VMEM.
    n_block = three_c
    if C >= 1024:
        for cand in (1536, 1024, 768, 512, 384, 256, 128):
            if three_c % cand == 0:
                n_block = cand
                break

    qkv_vmem = (2 * (row_block * C + C * n_block + row_block * n_block) * 2
                + 2 * n_block * 4)
    qkv = pl.pallas_call(
        _qkv_proj_kernel,
        out_shape=jax.ShapeDtypeStruct((rows_p, three_c), jnp.bfloat16),
        grid=(rows_p // row_block, three_c // n_block),
        in_specs=[
            pl.BlockSpec((row_block, C), lambda r, n: (r, 0)),
            pl.BlockSpec((C, n_block), lambda r, n: (0, n)),
            pl.BlockSpec((1, n_block), lambda r, n: (0, n)),
        ],
        out_specs=pl.BlockSpec((row_block, n_block), lambda r, n: (r, n)),
        compiler_params=_compiler_params(("parallel", "parallel"), qkv_vmem),
    )(x_bf, w_attn_bf, b_attn)
    qkv = qkv[:rows]

    # Head-major views (XLA transposes; K pre-transposed to (B, H, D, T) so
    # the kernel never transposes a k tile and its DMA is lane-dense on bk).
    qkv = qkv.reshape(B, T, 3, n_head, D)
    q = jnp.transpose(qkv[:, :, 0], (0, 2, 1, 3))   # (B, H, T, D)
    k = jnp.transpose(qkv[:, :, 1], (0, 2, 3, 1))   # (B, H, D, T)
    v = jnp.transpose(qkv[:, :, 2], (0, 2, 1, 3))   # (B, H, T, D)

    # ---- Kernel 2: flash-style attention + fused output projection ----
    bq = T if T <= block_q else block_q
    bk = T if T <= block_kv else block_kv
    assert T % bq == 0 and T % bk == 0

    # Clamp the kv block index on causally-skipped steps: the same resident
    # tile is revisited, so Pallas issues no new K/V DMA; compute is still
    # skipped by pl.when inside the kernel.
    def _kv_block(qi_, ki_):
        last_needed = (qi_ * bq + bq - 1) // bk
        return jnp.minimum(ki_, last_needed)

    kernel = functools.partial(_attn_proj_kernel,
                               block_q=bq, block_kv=bk,
                               scale=1.0 / math.sqrt(D))

    attn_vmem = (2 * (n_head * bq * D) * 2          # q tiles (double-buffered)
                 + 2 * 2 * (n_head * D * bk) * 2    # k + v tiles
                 + 2 * (n_head * D * C) * 2         # resident W_proj
                 + 2 * C * 4                        # bias
                 + 2 * (bq * C) * 4                 # output tile
                 + (2 * n_head * bq + n_head * bq * D) * 4)   # scratch

    out = pl.pallas_call(
        kernel,
        out_shape=jax.ShapeDtypeStruct((B, T, C), x.dtype),
        grid=(B, T // bq, T // bk),
        in_specs=[
            pl.BlockSpec((1, n_head, bq, D),
                         lambda b, qi, ki: (b, 0, qi, 0)),                 # q
            pl.BlockSpec((1, n_head, D, bk),
                         lambda b, qi, ki: (b, 0, 0, _kv_block(qi, ki))),  # k
            pl.BlockSpec((1, n_head, bk, D),
                         lambda b, qi, ki: (b, 0, _kv_block(qi, ki), 0)),  # v
            pl.BlockSpec((n_head, D, C), lambda b, qi, ki: (0, 0, 0)),     # W_proj
            pl.BlockSpec((1, C), lambda b, qi, ki: (0, 0)),                # b_proj
        ],
        out_specs=pl.BlockSpec((1, bq, C), lambda b, qi, ki: (b, qi, 0)),
        scratch_shapes=[
            pltpu.VMEM((n_head, bq, 1), jnp.float32),   # running max m
            pltpu.VMEM((n_head, bq, 1), jnp.float32),   # running sum l
            pltpu.VMEM((n_head, bq, D), jnp.float32),   # output accumulator
        ],
        compiler_params=_compiler_params(
            ("parallel", "parallel", "arbitrary"), attn_vmem),
    )(q, k, v, w_proj_hdc, b_proj)

    return out


# ------------------------------ f32 reference ---------------------------------
def _reference(x, w_attn, b_attn, w_proj, b_proj, *, n_head):
    """Pure-JAX f32 reference mirroring the PyTorch forward exactly."""
    B, T, C = x.shape
    D = C // n_head
    qkv = x @ w_attn + b_attn[0]
    q, k, v = jnp.split(qkv, 3, axis=2)
    q = q.reshape(B, T, n_head, D).transpose(0, 2, 1, 3)
    k = k.reshape(B, T, n_head, D).transpose(0, 2, 3, 1)
    v = v.reshape(B, T, n_head, D).transpose(0, 2, 1, 3)
    s = (q @ k) * (1.0 / math.sqrt(D))
    mask = jnp.tril(jnp.ones((T, T), dtype=jnp.float32))
    s = jnp.where(mask[None, None] == 0, -jnp.inf, s)
    p = jax.nn.softmax(s, axis=-1)
    o = (p @ v).transpose(0, 2, 1, 3).reshape(B, T, C)
    return o @ w_proj + b_proj[0]


if __name__ == "__main__":
    # Small shapes consistent with the module: batch=2, n_ctx=8, n_state=32,
    # n_head=4 (d_head=8).
    B, T, C, H = 2, 8, 32, 4

    key = jax.random.PRNGKey(0)
    kx, k1, k2, k3, k4 = jax.random.split(key, 5)

    x = jax.random.normal(kx, (B, T, C), dtype=jnp.float32)
    w_attn = jax.random.normal(k1, (C, 3 * C), jnp.float32) / math.sqrt(C)
    b_attn = jax.random.normal(k2, (1, 3 * C), jnp.float32) * 0.01
    w_proj = jax.random.normal(k3, (C, C), jnp.float32) / math.sqrt(C)
    b_proj = jax.random.normal(k4, (1, C), jnp.float32) * 0.01

    out = multi_head_self_attention(x, w_attn, b_attn, w_proj, b_proj, n_head=H)
    out = jax.block_until_ready(out)

    ref = _reference(x, w_attn, b_attn, w_proj, b_proj, n_head=H)
    assert out.shape == (B, T, C)
    # bf16 MXU inputs vs f32 reference -> loosened tolerance.
    assert jnp.allclose(out, ref, atol=1e-1, rtol=1e-1), \
        float(jnp.max(jnp.abs(out - ref)))

    print("KERNEL_OK")
</pallas_src>

<mosaic_0001>
module attributes {stable_mosaic.version = 11 : i64} {
  func.func @_qkv_proj_kernel(%arg0: i32, %arg1: i32, %arg2: memref<16x32xbf16, #tpu.memory_space<vmem>>, %arg3: memref<32x96xbf16, #tpu.memory_space<vmem>>, %arg4: memref<1x96xf32, #tpu.memory_space<vmem>>, %arg5: memref<16x96xbf16, #tpu.memory_space<vmem>>) attributes {dimension_semantics = [#tpu.dimension_semantics<parallel>, #tpu.dimension_semantics<parallel>], iteration_bounds = array<i64: 1, 1>, scalar_prefetch = 0 : i64, scratch_operands = 0 : i64, tpu.core_type = #tpu.core_type<tc>, window_params = [{transform_indices = @transform_0, window_bounds = array<i64: 16, 32>}, {transform_indices = @transform_1, window_bounds = array<i64: 32, 96>}, {transform_indices = @transform_2, window_bounds = array<i64: 1, 96>}, {transform_indices = @transform_3, window_bounds = array<i64: 16, 96>}]} {
    %c0 = arith.constant 0 : index
    %c0_0 = arith.constant 0 : index
    %0 = vector.load %arg2[%c0, %c0_0] : memref<16x32xbf16, #tpu.memory_space<vmem>>, vector<16x32xbf16>
    %c0_1 = arith.constant 0 : index
    %c0_2 = arith.constant 0 : index
    %1 = vector.load %arg3[%c0_1, %c0_2] : memref<32x96xbf16, #tpu.memory_space<vmem>>, vector<32x96xbf16>
    %cst = arith.constant dense<0.000000e+00> : vector<16x96xf32>
    %2 = tpu.matmul %0, %1, %cst {dimension_numbers = #tpu.dot_dimension_numbers<[1], [0], [0], [1], [0, 0, 1, 1], [], []>} : vector<16x32xbf16>, vector<32x96xbf16>, vector<16x96xf32> -> vector<16x96xf32>
    %c0_3 = arith.constant 0 : index
    %c0_4 = arith.constant 0 : index
    %3 = vector.load %arg4[%c0_3, %c0_4] : memref<1x96xf32, #tpu.memory_space<vmem>>, vector<1x96xf32>
    %4 = vector.broadcast %3 : vector<1x96xf32> to vector<16x96xf32>
    %5 = arith.addf %2, %4 : vector<16x96xf32>
    %6 = arith.truncf %5 : vector<16x96xf32> to vector<16x96xbf16>
    %c0_5 = arith.constant 0 : index
    %c0_6 = arith.constant 0 : index
    %7 = vector.load %arg5[%c0_5, %c0_6] : memref<16x96xbf16, #tpu.memory_space<vmem>>, vector<16x96xbf16>
    tpu.vector_store %arg5[%c0_5, %c0_6], %6 {strides = array<i32>} : memref<16x96xbf16, #tpu.memory_space<vmem>>, vector<16x96xbf16>,
    return
  }
  func.func @transform_0(%arg0: i32, %arg1: i32) -> (i32, i32) {
    %c0_i32 = arith.constant 0 : i32
    %c0_i32_0 = arith.constant 0 : i32
    return %arg0, %c0_i32 : i32, i32
  }
  func.func @transform_1(%arg0: i32, %arg1: i32) -> (i32, i32) {
    %c0_i32 = arith.constant 0 : i32
    %c0_i32_0 = arith.constant 0 : i32
    return %c0_i32, %arg1 : i32, i32
  }
  func.func @transform_2(%arg0: i32, %arg1: i32) -> (i32, i32) {
    %c0_i32 = arith.constant 0 : i32
    %c0_i32_0 = arith.constant 0 : i32
    return %c0_i32, %arg1 : i32, i32
  }
  func.func @transform_3(%arg0: i32, %arg1: i32) -> (i32, i32) {
    %c0_i32 = arith.constant 0 : i32
    return %arg0, %arg1 : i32, i32
  }
}

</mosaic_0001>

<bundles_post_ra>
// kernel: tpu_custom_call.1
= control target key start
LH: loop header
LB: loop body
LE: loop exit
PB: predicated region body
PF: predicated region fallthrough
CT: control target
= control target key end

     0   :  { %8 = vsyncpa [#allocation3], 0  ;;  %s292_s0 = inlined_call_operand.hbm [shape: bf16[16,32], index: 0, kind: input, shape index: {}]   ;;  %s293_s1 = inlined_call_operand.hbm [shape: bf16[32,96], index: 1, kind: input, shape index: {}]   ;;  %s294_s2 = inlined_call_operand.vmem [shape: f32[1,96], index: 2, kind: input, shape index: {}]   ;;  %s295_s3 = inlined_call_operand.hbm [shape: bf16[16,96], index: 3, kind: output, shape index: {}]  }
   0x1   :  { %9 = vsyncpa [#allocation6], 0 }
   0x2   :  { %10 = vsyncpa [#allocation4], 0  ;;  %s244_s12 = smov [#allocation2]  }
   0x3   :  { %s16_s13 = sshll.u32 %s244_s12, 4  ;;  %s17_s13 = int_to_ptr.vmem [resolvable:$true] %s16_s13 }
   0x4   :  { %s186_s14 = scalar_lea.vmem %s17_s13, 128  ;;  %p191_p1 = scmp.lt.s32.totalorder %s17_s13, %s17_s13 }
   0x5   :  { %p187_p0 = scmp.ne.s32.totalorder %s17_s13, %s186_s14  ;;  %p192_p2 = scmp.lt.s32.totalorder %s186_s14, %s186_s14 }
   0x7   :  { %p193_p3 = por %p192_p2, %p191_p1 }
   0x9   :  { %p194_p4 = pnand %p193_p3, %p187_p0 }
   0xb   :  { %197 = shalt.err (!%p194_p4)
}
   0xc   :  { %s245_s15 = smov 64   ;;  %s246_s16 = smov 4  }
   0xd   :  { %22 = dma.hbm_to_vmem [thread:$0]  %s292_s0, 128, %s17_s13, [#allocation3], %s245_s15, %s245_s15, %s246_s16  }
   0xe   :  { %s247_s19 = smov [#allocation5]  }
   0xf   :  { %s28_s20 = sshll.u32 %s247_s19, 4  ;;  %s29_s20 = int_to_ptr.vmem [resolvable:$true] %s28_s20 }
  0x10   :  { %s206_s21 = scalar_lea.vmem %s29_s20, 256  ;;  %p211_p6 = scmp.lt.s32.totalorder %s29_s20, %s29_s20 }
  0x11   :  { %p207_p5 = scmp.ne.s32.totalorder %s29_s20, %s206_s21  ;;  %p212_p7 = scmp.lt.s32.totalorder %s206_s21, %s206_s21 }
  0x13   :  { %p213_p8 = por %p212_p7, %p211_p6 }
  0x15   :  { %p214_p9 = pnand %p213_p8, %p207_p5 }
  0x17   :  { %217 = shalt.err (!%p214_p9)
}
  0x18   :  { %34 = dma.hbm_to_vmem [thread:$0]  %s293_s1, 256, %s29_s20, [#allocation6], %s245_s15, %s245_s15, %s246_s16  }
  0x19   :  { %238 = dma.done.wait [#allocation3], 128  }
  0x1a   :  { %239 = vsyncadd [#allocation3], 4294967168 }
  0x1b   :  { %240 = dma.done.wait [#allocation6], 256  }
  0x1c   :  { %241 = vsyncadd [#allocation6], 4294967040  ;;  %v248_v0 = vmov 0.0   ;;  %vm249_vm0 = vmmov 0   ;;  %v175_v1 = vld [vmem:[#allocation5 + $0x8] sm:$0xff]   ;;  %v176_v2 = vld [vmem:[#allocation5] sm:$0xff]  }
  0x1d   :  { %160 = vmatprep.subr.bf16.mxu0 %v248_v0  ;;  %164 = vmatprep.mubr.msk.bf16.mxu0 %vm249_vm0, %v248_v0  ;;  %v177_v3 = vld [vmem:[#allocation2] sm:$0xff]   ;;  %vm74_vm1 = vcmask 261120   ;;  %vm127_vm2 = vcmask 781312   ;;  %s250_s1 = smov [#allocation7]  }
  0x1e   :  { %161 = vmatpush3.bf16.msra.mxu0 %v175_v1  ;;  %v148_v4 = vld [vmem:[%s294_s2] ss:$0 sm:$0xff]  ;;  %s135_s25 = sshll.u32 %s250_s1, 4  ;;  %s136_s25 = int_to_ptr.vmem [resolvable:$true] %s135_s25 }
  0x1f   :  { %162 = vmatprep.subr.bf16.mxu0 %v248_v0  ;;  %s218_s26 = scalar_lea.vmem %s136_s25, 128  ;;  %p223_p11 = scmp.lt.s32.totalorder %s136_s25, %s136_s25 }
  0x20   :  { %p219_p10 = scmp.ne.s32.totalorder %s136_s25, %s218_s26  ;;  %p224_p12 = scmp.lt.s32.totalorder %s218_s26, %s218_s26 }
  0x22   :  { %163 = vmatpush3.bf16.msra.mxu0 %v176_v2  ;;  %p225_p13 = por %p224_p12, %p223_p11 }
  0x24   :  { %p226_p0 = pnand %p225_p13, %p219_p10 }
  0x25   :  { %165 = vmatmul.mubr.msk.bf16.vlgmr.msra.gmra.mxu0 %vm74_vm1, %v177_v3 }
  0xe5   :  { %v112_v5 = vpop.f32.mrf.mxu0 }
  0xe6   :  { %v113_v6 = vadd.f32 %v148_v4, %v112_v5 }
  0xe7   :  { %v166_v7 = vpop.f32.mrf.mxu0 }
  0xe8   :  { %v155_v8 = vpack.c.bf16 %v113_v6, %v113_v6 }
  0xe9   :  { %v115_v9 = vpop.f32.mrf.mxu0 }
  0xea   :  { %v116_v10 = vadd.f32 %v148_v4, %v115_v9  ;;  %128 = vst.msk [vmem:[#allocation7] sm:$0xf] %vm127_vm2, %v155_v8 }
  0xeb   :  { %v167_v11 = vpop.f32.mrf.mxu0 }
  0xec   :  { %v156_v12 = vpack.c.bf16 %v116_v10, %v116_v10 }
  0xee   :  { %129 = vst.msk [vmem:[#allocation7 + $0x4] sm:$0xf] %vm127_vm2, %v156_v12 }
  0xef   :  { %229 = shalt.err (!%p226_p0)
}
  0xf0   :  { %141 = dma.vmem_to_hbm [thread:$0]  %s136_s25, 128, %s295_s3, [#allocation4], %s245_s15, %s245_s15, %s246_s16  }
  0xf1   :  { %242 = dma.done.wait [#allocation4], 128  }
  0xf2   :  { %243 = vsyncadd [#allocation4], 4294967168 }
  0xf3   :  { %145 = vsyncpa [#allocation3], 1 }
  0xf4   :  { %146 = vsyncpa [#allocation6], 1 }
  0xf5   :  { %147 = vsyncpa [#allocation4], 1 }

</bundles_post_ra>
